<compile_context>
chip_gen: v7x
topology: tpu7x:2x2x1
jax: 0.10.0
libtpu: 0.0.40
codegen_flags: <defaults>
</compile_context>

<pallas_src>
import jax
import jax.numpy as jnp
from jax.experimental import pallas as pl
from jax.experimental.pallas import tpu as pltpu


def _hloss_row_kernel(x_ref, row_ref):
    """Per-row entropy of softmax(x) for one (tn, C) tile.

    x_ref:   (tn, C) logits tile (any float dtype; upcast to f32 in-register)
    row_ref: (tn, 1) output: -sum_c p*log p per row, f32
    """
    x = x_ref[...].astype(jnp.float32)

    # Numerically stable row-wise entropy along the class axis (lanes):
    #   z = x - max, e = exp(z), s = sum(e), r = sum(e*z)
    #   -sum_c p*log p = log(s) - r / s
    m = jnp.max(x, axis=1, keepdims=True)          # (tn, 1)
    z = x - m
    e = jnp.exp(z)
    s = jnp.sum(e, axis=1, keepdims=True)          # (tn, 1)
    r = jnp.sum(e * z, axis=1, keepdims=True)      # (tn, 1)

    # Reciprocal/log are per-row only (tn values, not tn*C). Exact reciprocal
    # keeps ~1e-7 accuracy; approx=True (EUP fast path) is a free alternative
    # if callers tolerate ~bf16-level error on the per-row term.
    ent = jnp.log(s) - r * pl.reciprocal(s, approx=False)
    row_ref[...] = ent.astype(row_ref.dtype)


def _pick_row_tile(n, c, itemsize, vmem_budget_bytes):
    """Largest row tile whose double-buffered input tile fits the VMEM budget."""
    quant = 8 if itemsize >= 4 else (16 if itemsize == 2 else 32)
    rows = vmem_budget_bytes // (2 * c * itemsize)   # 2x: double buffering
    rows = max(quant, min(1024, int(rows)))
    rows = (rows // quant) * quant
    # Never exceed the (row-quantum padded) batch size.
    n_padded_min = ((n + quant - 1) // quant) * quant
    return max(quant, min(rows, n_padded_min))
    # TODO(synk): for extremely large C (C*itemsize*16 > budget) the class axis
    # itself would need tiling with an online max/sum; not needed at these sizes.


def hloss(x, full=False, *, row_tile=None, vmem_budget_bytes=20 * 1024 * 1024):
    """Pallas TPU implementation of HLoss.forward for x of shape (N, C)."""
    n, c = x.shape
    itemsize = jnp.dtype(x.dtype).itemsize
    if row_tile is None:
        tn = _pick_row_tile(n, c, itemsize, vmem_budget_bytes)
    else:
        quant = 8 if itemsize >= 4 else 16
        tn = max(quant, (int(row_tile) // quant) * quant)

    grid = (pl.cdiv(n, tn),)
    n_pad = grid[0] * tn
    if n_pad != n:
        # Pad the batch so the grid tiles it exactly; padded rows are dropped
        # below before any reduction, so their log(C) entropies never leak.
        x = jnp.pad(x, ((0, n_pad - n), (0, 0)))

    rows = pl.pallas_call(
        _hloss_row_kernel,
        out_shape=jax.ShapeDtypeStruct((n_pad, 1), jnp.float32),
        grid=grid,
        in_specs=[pl.BlockSpec((tn, c), lambda i: (i, 0))],
        out_specs=pl.BlockSpec((tn, 1), lambda i: (i, 0)),
        compiler_params=pltpu.CompilerParams(
            # No cross-step state -> fully parallel grid (both TCs on v7x).
            dimension_semantics=("parallel",),
            # Large tiles exceed v5e's 16 MiB default scoped VMEM; 32 MiB is
            # within physical VMEM on v5e/v6e (128 MiB) and v7x (64 MiB).
            vmem_limit_bytes=32 * 1024 * 1024,
        ),
    )(x)

    row_ent = rows[:n, 0]                      # (N,), f32, padding dropped
    if full:
        return row_ent.astype(x.dtype)         # -b.sum(1)
    # full=False: -b.sum()/N == mean of per-row entropies. Reducing N floats in
    # the wrapper keeps the kernel grid free of a serializing accumulator.
    return (jnp.sum(row_ent) / n).astype(x.dtype)


def _hloss_ref(x, full=False):
    x = x.astype(jnp.float32)
    logp = jax.nn.log_softmax(x, axis=1)
    p = jax.nn.softmax(x, axis=1)
    b = p * logp
    if full:
        return -1.0 * b.sum(axis=1)
    return -1.0 * b.sum() / x.shape[0]


if __name__ == "__main__":
    key = jax.random.PRNGKey(0)
    k1, k2 = jax.random.split(key)

    # Small shape consistent with the module's forward: logits x of shape (N, C).
    N, C = 8, 32
    x = jax.random.normal(k1, (N, C), dtype=jnp.float32)

    out_scalar = jax.block_until_ready(hloss(x, full=False))
    out_full = jax.block_until_ready(hloss(x, full=True))
    assert jnp.allclose(out_scalar, _hloss_ref(x, full=False), atol=1e-5, rtol=1e-5)
    assert jnp.allclose(out_full, _hloss_ref(x, full=True), atol=1e-5, rtol=1e-5)

    # Exercise the padded-tail path (N not a multiple of the row quantum).
    N2, C2 = 37, 160
    x2 = jax.random.normal(k2, (N2, C2), dtype=jnp.float32)
    out2_scalar = jax.block_until_ready(hloss(x2, full=False))
    out2_full = jax.block_until_ready(hloss(x2, full=True))
    assert jnp.allclose(out2_scalar, _hloss_ref(x2, full=False), atol=1e-5, rtol=1e-5)
    assert jnp.allclose(out2_full, _hloss_ref(x2, full=True), atol=1e-5, rtol=1e-5)

    print("KERNEL_OK")
</pallas_src>

<mosaic_0001>
module attributes {stable_mosaic.version = 11 : i64} {
  func.func @_hloss_row_kernel(%arg0: i32, %arg1: memref<8x32xf32, #tpu.memory_space<vmem>>, %arg2: memref<8x1xf32, #tpu.memory_space<vmem>>) attributes {dimension_semantics = [#tpu.dimension_semantics<parallel>], iteration_bounds = array<i64: 1>, scalar_prefetch = 0 : i64, scratch_operands = 0 : i64, tpu.core_type = #tpu.core_type<tc>, window_params = [{transform_indices = @transform_0, window_bounds = array<i64: 8, 32>}, {transform_indices = @transform_1, window_bounds = array<i64: 8, 1>}]} {
    %c0 = arith.constant 0 : index
    %c0_0 = arith.constant 0 : index
    %0 = vector.load %arg1[%c0, %c0_0] : memref<8x32xf32, #tpu.memory_space<vmem>>, vector<8x32xf32>
    %cst = arith.constant dense<0xFF800000> : vector<8xf32>
    %1 = vector.multi_reduction <maximumf>, %0, %cst [1] : vector<8x32xf32> to vector<8xf32>
    %2 = vector.shape_cast %1 : vector<8xf32> to vector<8x1xf32>
    %3 = vector.broadcast %2 : vector<8x1xf32> to vector<8x32xf32>
    %4 = arith.subf %0, %3 : vector<8x32xf32>
    %5 = math.exp %4 : vector<8x32xf32>
    %cst_1 = arith.constant dense<0.000000e+00> : vector<8xf32>
    %6 = vector.multi_reduction <add>, %5, %cst_1 [1] : vector<8x32xf32> to vector<8xf32>
    %7 = vector.shape_cast %6 : vector<8xf32> to vector<8x1xf32>
    %8 = arith.mulf %5, %4 : vector<8x32xf32>
    %cst_2 = arith.constant dense<0.000000e+00> : vector<8xf32>
    %9 = vector.multi_reduction <add>, %8, %cst_2 [1] : vector<8x32xf32> to vector<8xf32>
    %10 = vector.shape_cast %9 : vector<8xf32> to vector<8x1xf32>
    %11 = math.log %7 : vector<8x1xf32>
    %12 = tpu.reciprocal %7 : vector<8x1xf32> -> vector<8x1xf32>
    %13 = arith.mulf %10, %12 : vector<8x1xf32>
    %14 = arith.subf %11, %13 : vector<8x1xf32>
    %c0_3 = arith.constant 0 : index
    %c0_4 = arith.constant 0 : index
    %15 = vector.load %arg2[%c0_3, %c0_4] : memref<8x1xf32, #tpu.memory_space<vmem>>, vector<8x1xf32>
    tpu.vector_store %arg2[%c0_3, %c0_4], %14 {strides = array<i32>} : memref<8x1xf32, #tpu.memory_space<vmem>>, vector<8x1xf32>,
    return
  }
  func.func @transform_0(%arg0: i32) -> (i32, i32) {
    %c0_i32 = arith.constant 0 : i32
    %c0_i32_0 = arith.constant 0 : i32
    return %arg0, %c0_i32 : i32, i32
  }
  func.func @transform_1(%arg0: i32) -> (i32, i32) {
    %c0_i32 = arith.constant 0 : i32
    %c0_i32_0 = arith.constant 0 : i32
    return %arg0, %c0_i32 : i32, i32
  }
}

</mosaic_0001>

<bundles_post_ra>
// kernel: tpu_custom_call.1
= control target key start
LH: loop header
LB: loop body
LE: loop exit
PB: predicated region body
PF: predicated region fallthrough
CT: control target
= control target key end

     0   :  { %6 = vsyncpa [#allocation3], 0  ;;  %s78_s6 = smov [#allocation2]   ;;  %s104_s0 = inlined_call_operand.hbm [shape: f32[8,32], index: 0, kind: input, shape index: {}]   ;;  %s105_s1 = inlined_call_operand.vmem [shape: f32[8,1], index: 1, kind: output, shape index: {}]  }
   0x1   :  { %s13_s7 = sshll.u32 %s78_s6, 4  ;;  %s54_s10 = scalar_lea.hbm %s104_s0, 128  ;;  %s14_s7 = int_to_ptr.vmem [resolvable:$true] %s13_s7 }
   0x2   :  { %p55_p0 = scmp.ne.s32.totalorder %s104_s0, %s54_s10  ;;  %p58_p1 = scmp.lt.u32.totalorder %s54_s10, %s104_s0 }
   0x4   :  { %p60_p2 = pnand %p58_p1, %p55_p0 }
   0x6   :  { %63 = shalt.err (!%p60_p2)
}
   0x7   :  { %s64_s15 = scalar_lea.vmem %s14_s7, 128  ;;  %p69_p4 = scmp.lt.s32.totalorder %s14_s7, %s14_s7 }
   0x8   :  { %p65_p3 = scmp.ne.s32.totalorder %s14_s7, %s64_s15  ;;  %p70_p5 = scmp.lt.s32.totalorder %s64_s15, %s64_s15 }
   0xa   :  { %p71_p6 = por %p70_p5, %p69_p4 }
   0xc   :  { %p72_p7 = pnand %p71_p6, %p65_p3 }
   0xe   :  { %75 = shalt.err (!%p72_p7)
}
   0xf   :  { %16 = dma.hbm_to_vmem [thread:$0]  %s104_s0, 128, %s14_s7, [#allocation3]  }
  0x10   :  { %76 = dma.done.wait [#allocation3], 128  }
  0x11   :  { %77 = vsyncadd [#allocation3], 4294967168  ;;  %vm21_vm0 = vcmask 261120   ;;  %v20_v0 = vld [vmem:[#allocation2] sm:$0xff]  ;;  %vm40_vm1 = vcmask 7168  }
  0x12   :  { %v22_v1 = vsel %vm21_vm0, %v20_v0, -inf }
  0x13   :  { %23 = vmax.xlane.f32.xlu0 %v22_v1 }
  0xa0   :  { %v24_v2 = vpop.xlane.xlu0 %23 }
  0xa1   :  { %v25_v3 = vsub.f32 %v20_v0, %v24_v2 }
  0xa3   :  { %v26_v4 = vmul.f32 1.442695, %v25_v3 }
  0xa5   :  { %48 = vpow2.f32 %v26_v4 }
  0xaf   :  { %v49_v5 = vpop.eup %48 }
  0xb0   :  { %v28_v6 = vsel %vm21_vm0, %v49_v5, 0.0  ;;  %v31_v7 = vmul.f32 %v49_v5, %v25_v3 }
  0xb1   :  { %29 = vadd.xlane.f32.xlu0 %v28_v6 }
  0xb2   :  { %v32_v8 = vsel %vm21_vm0, %v31_v7, 0.0 }
  0xb3   :  { %33 = vadd.xlane.f32.xlu1 %v32_v8 }
 0x13e   :  { %v30_v9 = vpop.xlane.xlu0 %29 }
 0x13f   :  { %50 = vlog2.f32 %v30_v9 }
 0x140   :  { %52 = vrcp.f32 %v30_v9  ;;  %v34_v13 = vpop.xlane.xlu1 %33 }
 0x149   :  { %v51_v10 = vpop.eup %50 }
 0x14a   :  { %v53_v11 = vpop.eup %52  ;;  %v36_v12 = vmul.f32 0.6931472, %v51_v10 }
 0x14b   :  { %v38_v14 = vmul.f32 %v53_v11, %v34_v13 }
 0x14d   :  { %v39_v15 = vsub.f32 %v36_v12, %v38_v14 }
 0x14f   :  { %41 = vst.msk [vmem:[%s105_s1] sm:$0xff] %vm40_vm1, %v39_v15 }
 0x150   :  { %46 = vsyncpa [#allocation3], 1 }

</bundles_post_ra>
